<compile_context>
chip_gen: v7x
topology: tpu7x:2x2x1
jax: 0.10.0
libtpu: 0.0.40
codegen_flags: <defaults>
</compile_context>

<pallas_src>
import jax
import jax.numpy as jnp
from jax.experimental import pallas as pl
from jax.experimental.pallas import tpu as pltpu


def _round_up(v, m):
    return (v + m - 1) // m * m


def _gcn_fused_kernel(x_ref, w_ref, adj_ref, o_ref, support_ref):
    """One output row-tile of relu(adj @ (x @ W)); `support` resident in VMEM."""
    # Compute support = x @ W exactly once; the scratch persists across the
    # (sequential, "arbitrary") row-tile grid.
    @pl.when(pl.program_id(0) == 0)
    def _():
        support_ref[...] = jnp.dot(
            x_ref[...], w_ref[...],
            preferred_element_type=jnp.float32).astype(support_ref.dtype)

    acc = jnp.dot(adj_ref[...], support_ref[...],
                  preferred_element_type=jnp.float32)
    o_ref[...] = jnp.maximum(acc, 0.0).astype(o_ref.dtype)


def graph_convolution_forward(x, adj, weight, *, compute_dtype=jnp.bfloat16,
                              row_tile=256):
    """relu(adj @ (x @ weight)) via a single fused Pallas TPU kernel."""
    N, f_in = x.shape
    f_in_w, f_out = weight.shape
    assert f_in == f_in_w, (x.shape, weight.shape)
    assert adj.shape == (N, N), adj.shape
    out_dtype = x.dtype

    # Zero-pad to lane/sublane friendly multiples of 128. Zero padding is exact:
    # padded rows/cols contribute nothing and are sliced off at the end.
    n_pad = _round_up(N, 128)
    f_in_pad = _round_up(f_in, 128)
    f_out_pad = _round_up(f_out, 128)
    tm = row_tile if n_pad % row_tile == 0 else 128

    # TODO(synk): dropout (module default p=0.0) is an identity; non-zero
    # training-time dropout would be applied to x here, before the first matmul.
    x_p = jnp.pad(x.astype(compute_dtype),
                  ((0, n_pad - N), (0, f_in_pad - f_in)))
    w_p = jnp.pad(weight.astype(compute_dtype),
                  ((0, f_in_pad - f_in), (0, f_out_pad - f_out)))
    adj_p = jnp.pad(adj.astype(compute_dtype),
                    ((0, n_pad - N), (0, n_pad - N)))

    itemsize = jnp.dtype(compute_dtype).itemsize
    resident_bytes = (n_pad * f_in_pad + f_in_pad * f_out_pad
                      + n_pad * f_out_pad) * itemsize            # x, W, support
    streamed_bytes = 2 * tm * (n_pad + f_out_pad) * itemsize     # adj + out (2x buffered)
    # TODO(synk): add a tiled / block-sparse fallback when the resident footprint
    # does not fit VMEM (v7x has only 64 MiB per TensorCore).
    assert resident_bytes + streamed_bytes < 40 * 1024 * 1024, (
        "graph too large for the fully-resident fused kernel")

    out = pl.pallas_call(
        _gcn_fused_kernel,
        out_shape=jax.ShapeDtypeStruct((n_pad, f_out_pad), out_dtype),
        grid_spec=pltpu.PrefetchScalarGridSpec(
            num_scalar_prefetch=0,
            grid=(n_pad // tm,),
            in_specs=[
                # x and W use constant index maps -> DMA'd once, stay resident.
                pl.BlockSpec((n_pad, f_in_pad), lambda i: (0, 0)),
                pl.BlockSpec((f_in_pad, f_out_pad), lambda i: (0, 0)),
                # adj is streamed one row tile per grid step.
                pl.BlockSpec((tm, n_pad), lambda i: (i, 0)),
            ],
            out_specs=pl.BlockSpec((tm, f_out_pad), lambda i: (i, 0)),
            scratch_shapes=[pltpu.VMEM((n_pad, f_out_pad), compute_dtype)],
        ),
        compiler_params=pltpu.CompilerParams(
            # "arbitrary" keeps the grid sequential on one core so the support
            # scratch written at step 0 is visible to every row tile.
            dimension_semantics=("arbitrary",),
            # Raise v5e's 16 MiB default scoped VMEM; well within v7x's 64 MiB.
            vmem_limit_bytes=48 * 1024 * 1024,
        ),
    )(x_p, w_p, adj_p)
    return out[:N, :f_out]


def xavier_uniform(key, shape, dtype=jnp.float32):
    fan_in, fan_out = shape
    bound = (6.0 / (fan_in + fan_out)) ** 0.5
    return jax.random.uniform(key, shape, dtype=dtype, minval=-bound, maxval=bound)


def _make_inputs(key, n, f_in, f_out):
    k_x, k_adj, k_w = jax.random.split(key, 3)
    x = jax.random.normal(k_x, (n, f_in), dtype=jnp.float32)
    adj = (jax.random.uniform(k_adj, (n, n)) < 0.05).astype(jnp.float32)
    adj = adj + jnp.eye(n, dtype=jnp.float32)
    adj = adj / jnp.sum(adj, axis=1, keepdims=True)   # row-normalized adjacency
    w = xavier_uniform(k_w, (f_in, f_out))
    return x, adj, w


if __name__ == "__main__":
    key = jax.random.PRNGKey(0)
    k0, k1 = jax.random.split(key)

    # Case 1: small aligned shapes consistent with the module.
    N, in_features, out_features = 256, 128, 128
    x, adj, weight = _make_inputs(k0, N, in_features, out_features)
    out = graph_convolution_forward(x, adj, weight)
    out = jax.block_until_ready(out)
    ref = jnp.maximum(adj @ (x @ weight), 0.0)
    assert out.shape == (N, out_features)
    # bf16 operands with f32 accumulation -> looser tolerance vs f32 reference.
    assert jnp.allclose(out, ref, atol=3e-2, rtol=3e-2), \
        float(jnp.max(jnp.abs(out - ref)))

    # Case 2: ragged (non-128-divisible) shapes exercise the padding path.
    N2, f_in2, f_out2 = 100, 48, 40
    x2, adj2, w2 = _make_inputs(k1, N2, f_in2, f_out2)
    out2 = graph_convolution_forward(x2, adj2, w2)
    out2 = jax.block_until_ready(out2)
    ref2 = jnp.maximum(adj2 @ (x2 @ w2), 0.0)
    assert out2.shape == (N2, f_out2)
    assert jnp.allclose(out2, ref2, atol=3e-2, rtol=3e-2), \
        float(jnp.max(jnp.abs(out2 - ref2)))

    print("KERNEL_OK")
</pallas_src>

<mosaic_0001>
module attributes {stable_mosaic.version = 11 : i64} {
  func.func @_gcn_fused_kernel(%arg0: i32, %arg1: memref<256x128xbf16, #tpu.memory_space<vmem>>, %arg2: memref<128x128xbf16, #tpu.memory_space<vmem>>, %arg3: memref<256x256xbf16, #tpu.memory_space<vmem>>, %arg4: memref<256x128xf32, #tpu.memory_space<vmem>>, %arg5: memref<256x128xbf16, #tpu.memory_space<vmem>>) attributes {dimension_semantics = [#tpu.dimension_semantics<arbitrary>], iteration_bounds = array<i64: 1>, scalar_prefetch = 0 : i64, scratch_operands = 1 : i64, tpu.core_type = #tpu.core_type<tc>, window_params = [{pipeline_mode = #tpu.pipeline_mode<synchronous>, transform_indices = @transform_0, window_bounds = array<i64: 256, 128>}, {pipeline_mode = #tpu.pipeline_mode<synchronous>, transform_indices = @transform_1, window_bounds = array<i64: 128, 128>}, {transform_indices = @transform_2, window_bounds = array<i64: 256, 256>}, {transform_indices = @transform_3, window_bounds = array<i64: 256, 128>}]} {
    %c0_i32 = arith.constant 0 : i32
    %0 = arith.cmpi eq, %arg0, %c0_i32 : i32
    %1 = arith.extui %0 : i1 to i32
    %c0_i32_0 = arith.constant 0 : i32
    %2 = arith.cmpi ne, %1, %c0_i32_0 : i32
    scf.if %2 {
      %c0_7 = arith.constant 0 : index
      %c0_8 = arith.constant 0 : index
      %9 = vector.load %arg1[%c0_7, %c0_8] : memref<256x128xbf16, #tpu.memory_space<vmem>>, vector<256x128xbf16>
      %c0_9 = arith.constant 0 : index
      %c0_10 = arith.constant 0 : index
      %10 = vector.load %arg2[%c0_9, %c0_10] : memref<128x128xbf16, #tpu.memory_space<vmem>>, vector<128x128xbf16>
      %cst_11 = arith.constant dense<0.000000e+00> : vector<256x128xf32>
      %11 = tpu.matmul %9, %10, %cst_11 {dimension_numbers = #tpu.dot_dimension_numbers<[1], [0], [0], [1], [0, 0, 1, 1], [], []>} : vector<256x128xbf16>, vector<128x128xbf16>, vector<256x128xf32> -> vector<256x128xf32>
      %12 = arith.truncf %11 : vector<256x128xf32> to vector<256x128xbf16>
      %c0_12 = arith.constant 0 : index
      %c0_13 = arith.constant 0 : index
      %13 = vector.load %arg5[%c0_12, %c0_13] : memref<256x128xbf16, #tpu.memory_space<vmem>>, vector<256x128xbf16>
      tpu.vector_store %arg5[%c0_12, %c0_13], %12 {strides = array<i32>} : memref<256x128xbf16, #tpu.memory_space<vmem>>, vector<256x128xbf16>,
    } else {
    }
    %c0 = arith.constant 0 : index
    %c0_1 = arith.constant 0 : index
    %3 = vector.load %arg3[%c0, %c0_1] : memref<256x256xbf16, #tpu.memory_space<vmem>>, vector<256x256xbf16>
    %c0_2 = arith.constant 0 : index
    %c0_3 = arith.constant 0 : index
    %4 = vector.load %arg5[%c0_2, %c0_3] : memref<256x128xbf16, #tpu.memory_space<vmem>>, vector<256x128xbf16>
    %cst = arith.constant dense<0.000000e+00> : vector<256x128xf32>
    %5 = tpu.matmul %3, %4, %cst {dimension_numbers = #tpu.dot_dimension_numbers<[1], [0], [0], [1], [0, 0, 1, 1], [], []>} : vector<256x256xbf16>, vector<256x128xbf16>, vector<256x128xf32> -> vector<256x128xf32>
    %cst_4 = arith.constant 0.000000e+00 : f32
    %6 = vector.broadcast %cst_4 : f32 to vector<256x128xf32>
    %7 = arith.maximumf %5, %6 : vector<256x128xf32>
    %c0_5 = arith.constant 0 : index
    %c0_6 = arith.constant 0 : index
    %8 = vector.load %arg4[%c0_5, %c0_6] : memref<256x128xf32, #tpu.memory_space<vmem>>, vector<256x128xf32>
    tpu.vector_store %arg4[%c0_5, %c0_6], %7 {strides = array<i32>} : memref<256x128xf32, #tpu.memory_space<vmem>>, vector<256x128xf32>,
    return
  }
  func.func @transform_0(%arg0: i32) -> (i32, i32) {
    %c0_i32 = arith.constant 0 : i32
    %c0_i32_0 = arith.constant 0 : i32
    %c0_i32_1 = arith.constant 0 : i32
    return %c0_i32, %c0_i32_0 : i32, i32
  }
  func.func @transform_1(%arg0: i32) -> (i32, i32) {
    %c0_i32 = arith.constant 0 : i32
    %c0_i32_0 = arith.constant 0 : i32
    %c0_i32_1 = arith.constant 0 : i32
    return %c0_i32, %c0_i32_0 : i32, i32
  }
  func.func @transform_2(%arg0: i32) -> (i32, i32) {
    %c0_i32 = arith.constant 0 : i32
    %c0_i32_0 = arith.constant 0 : i32
    return %arg0, %c0_i32 : i32, i32
  }
  func.func @transform_3(%arg0: i32) -> (i32, i32) {
    %c0_i32 = arith.constant 0 : i32
    %c0_i32_0 = arith.constant 0 : i32
    return %arg0, %c0_i32 : i32, i32
  }
}

</mosaic_0001>

<bundles_post_ra>
// kernel: tpu_custom_call.1
= control target key start
LH: loop header
LB: loop body
LE: loop exit
PB: predicated region body
PF: predicated region fallthrough
CT: control target
= control target key end

     0   :  { %8 = vsyncpa [#allocation4], 0  ;;  %s1416_s0 = inlined_call_operand.hbm [shape: bf16[256,128], index: 0, kind: input, shape index: {}]   ;;  %s1417_s1 = inlined_call_operand.hbm [shape: bf16[128,128], index: 1, kind: input, shape index: {}]   ;;  %s1418_s2 = inlined_call_operand.hbm [shape: bf16[256,256], index: 2, kind: input, shape index: {}]   ;;  %s1419_s3 = inlined_call_operand.hbm [shape: f32[256,128], index: 3, kind: output, shape index: {}]  }
   0x1   :  { %9 = vsyncpa [#allocation7], 0 }
   0x2   :  { %10 = vsyncpa [#allocation5], 0  ;;  %s1327_s12 = smov [#allocation6]   ;;  %s1328_s14 = smov [#allocation3]  }
   0x3   :  { %s28_s13 = sshll.u32 %s1327_s12, 4  ;;  %s16_s15 = sshll.u32 %s1328_s14, 4  ;;  %s29_s13 = int_to_ptr.vmem [resolvable:$true] %s28_s13  ;;  %s1355_s15 = int_to_ptr.vmem [resolvable:$true] %s16_s15 }
   0x4   :  { %s1233_s18 = scalar_lea.hbm %s1417_s1, 1024 }
   0x5   :  { %p1234_p0 = scmp.ne.s32.totalorder %s1417_s1, %s1233_s18  ;;  %p1237_p1 = scmp.lt.u32.totalorder %s1233_s18, %s1417_s1 }
   0x7   :  { %p1239_p2 = pnand %p1237_p1, %p1234_p0 }
   0x9   :  { %1242 = shalt.err (!%p1239_p2)
}
   0xa   :  { %s1243_s23 = scalar_lea.vmem %s29_s13, 1024  ;;  %p1248_p4 = scmp.lt.s32.totalorder %s29_s13, %s29_s13 }
   0xb   :  { %p1244_p3 = scmp.ne.s32.totalorder %s29_s13, %s1243_s23  ;;  %p1249_p5 = scmp.lt.s32.totalorder %s1243_s23, %s1243_s23 }
   0xd   :  { %p1250_p6 = por %p1249_p5, %p1248_p4 }
   0xf   :  { %p1251_p7 = pnand %p1250_p6, %p1244_p3 }
  0x11   :  { %1254 = shalt.err (!%p1251_p7)
}
  0x12   :  { %s1329_s24 = smov 64   ;;  %s1330_s25 = smov 4  }
  0x13   :  { %34 = dma.hbm_to_vmem [thread:$0]  %s1417_s1, 1024, %s29_s13, [#allocation7], %s1329_s24, %s1329_s24, %s1330_s25  }
  0x14   :  { %s1255_s30 = scalar_lea.hbm %s1416_s0, 2048 }
  0x15   :  { %p1256_p8 = scmp.ne.s32.totalorder %s1416_s0, %s1255_s30  ;;  %p1259_p9 = scmp.lt.u32.totalorder %s1255_s30, %s1416_s0 }
  0x17   :  { %p1261_p10 = pnand %p1259_p9, %p1256_p8 }
  0x19   :  { %1264 = shalt.err (!%p1261_p10)
}
  0x1a   :  { %s1265_s8 = scalar_lea.vmem %s1355_s15, 2048  ;;  %p1270_p12 = scmp.lt.s32.totalorder %s1355_s15, %s1355_s15 }
  0x1b   :  { %p1266_p11 = scmp.ne.s32.totalorder %s1355_s15, %s1265_s8  ;;  %p1271_p13 = scmp.lt.s32.totalorder %s1265_s8, %s1265_s8 }
  0x1d   :  { %p1272_p0 = por %p1271_p13, %p1270_p12 }
  0x1f   :  { %p1273_p1 = pnand %p1272_p0, %p1266_p11 }
  0x21   :  { %1276 = shalt.err (!%p1273_p1)
}
  0x22   :  { %22 = dma.hbm_to_vmem [thread:$0]  %s1416_s0, 2048, %s1355_s15, [#allocation4], %s1329_s24, %s1329_s24, %s1330_s25  }
  0x23   :  { %s1331_s10 = smov [#allocation8]   ;;  %s1277_s14 = scalar_lea.hbm %s1418_s2, 4096 }
  0x24   :  { %s40_s11 = sshll.u32 %s1331_s10, 4  ;;  %p1278_p2 = scmp.ne.s32.totalorder %s1418_s2, %s1277_s14  ;;  %s41_s11 = int_to_ptr.vmem [resolvable:$true] %s40_s11 }
  0x25   :  { %p1281_p3 = scmp.lt.u32.totalorder %s1277_s14, %s1418_s2 }
  0x27   :  { %p1283_p4 = pnand %p1281_p3, %p1278_p2 }
  0x29   :  { %1286 = shalt.err (!%p1283_p4)
}
  0x2a   :  { %s1287_s20 = scalar_lea.vmem %s41_s11, 4096  ;;  %p1292_p6 = scmp.lt.s32.totalorder %s41_s11, %s41_s11 }
  0x2b   :  { %p1288_p5 = scmp.ne.s32.totalorder %s41_s11, %s1287_s20  ;;  %p1293_p7 = scmp.lt.s32.totalorder %s1287_s20, %s1287_s20 }
  0x2d   :  { %p1294_p8 = por %p1293_p7, %p1292_p6 }
  0x2f   :  { %p1295_p9 = pnand %p1294_p8, %p1288_p5 }
  0x31   :  { %1298 = shalt.err (!%p1295_p9)
}
  0x32   :  { %s1332_s0 = smov 128   ;;  %s1333_s15 = smov 8  }
  0x33   :  { %46 = dma.hbm_to_vmem [thread:$0]  %s1418_s2, 4096, %s41_s11, [#allocation7], %s1332_s0, %s1332_s0, %s1333_s15  }
  0x34   :  { %1321 = dma.done.wait [#allocation4], 2048  }
  0x35   :  { %1322 = vsyncadd [#allocation4], 4294965248 }
  0x36   :  { %1323 = dma.done.wait [#allocation7], 5120  }
  0x37   :  { %1324 = vsyncadd [#allocation7], 4294962176  ;;  %v1161_v0 = vld [vmem:[#allocation6] sm:$0xff]   ;;  %v1162_v1 = vld [vmem:[#allocation6 + $0x8] sm:$0xff]   ;;  %s1334_s2 = smov [#allocation9]  }
  0x38   :  { %1089 = vmatprep.subr.bf16.mxu0 %v1161_v0  ;;  %v1163_v2 = vld [vmem:[#allocation6 + $0x10] sm:$0xff]   ;;  %v1164_v3 = vld [vmem:[#allocation6 + $0x18] sm:$0xff]   ;;  %v1169_v4 = vld [vmem:[#allocation3] sm:$0xff]   ;;  %s884_s23 = sshll.u32 %s1334_s2, 4  ;;  %s885_s23 = int_to_ptr.vmem [resolvable:$true] %s884_s23 }
  0x39   :  { %1090 = vmatpush3.bf16.msra.mxu0 %v1161_v0  ;;  %1105 = vmatprep.mubr.bf16.mxu0 %v1169_v4  ;;  %v1165_v5 = vld [vmem:[#allocation6 + $0x20] sm:$0xff]   ;;  %v1166_v6 = vld [vmem:[#allocation6 + $0x28] sm:$0xff]   ;;  %v1167_v7 = vld [vmem:[#allocation6 + $0x30] sm:$0xff]   ;;  %s1299_s24 = scalar_lea.vmem %s885_s23, 4096  ;;  %p1304_p11 = scmp.lt.s32.totalorder %s885_s23, %s885_s23 }
  0x3a   :  { %1091 = vmatprep.subr.bf16.mxu0 %v1162_v1  ;;  %v1168_v8 = vld [vmem:[#allocation6 + $0x38] sm:$0xff]   ;;  %v1170_v9 = vld [vmem:[#allocation3 + $0x8] sm:$0xff]   ;;  %v1171_v10 = vld [vmem:[#allocation3 + $0x10] sm:$0xff]   ;;  %p1300_p10 = scmp.ne.s32.totalorder %s885_s23, %s1299_s24  ;;  %p1305_p12 = scmp.lt.s32.totalorder %s1299_s24, %s1299_s24 }
  0x3b   :  { %v1172_v11 = vld [vmem:[#allocation3 + $0x18] sm:$0xff]   ;;  %v1173_v12 = vld [vmem:[#allocation3 + $0x20] sm:$0xff]   ;;  %v1174_v13 = vld [vmem:[#allocation3 + $0x28] sm:$0xff]  }
  0x3c   :  { %v1175_v14 = vld [vmem:[#allocation3 + $0x30] sm:$0xff]   ;;  %v1176_v15 = vld [vmem:[#allocation3 + $0x38] sm:$0xff]   ;;  %v1177_v16 = vld [vmem:[#allocation3 + $0x40] sm:$0xff]   ;;  %p1306_p13 = por %p1305_p12, %p1304_p11 }
  0x3d   :  { %1092 = vmatpush3.bf16.msra.mxu0 %v1162_v1  ;;  %v1178_v17 = vld [vmem:[#allocation3 + $0x48] sm:$0xff]   ;;  %v1179_v18 = vld [vmem:[#allocation3 + $0x50] sm:$0xff]   ;;  %v1180_v19 = vld [vmem:[#allocation3 + $0x58] sm:$0xff]  }
  0x3e   :  { %1093 = vmatprep.subr.bf16.mxu0 %v1163_v2  ;;  %v1181_v20 = vld [vmem:[#allocation3 + $0x60] sm:$0xff]   ;;  %v1182_v21 = vld [vmem:[#allocation3 + $0x68] sm:$0xff]   ;;  %v1183_v22 = vld [vmem:[#allocation3 + $0x70] sm:$0xff]   ;;  %p1307_p0 = pnand %p1306_p13, %p1300_p10 }
  0x3f   :  { %v1184_v23 = vld [vmem:[#allocation3 + $0x78] sm:$0xff]   ;;  %v1187_v24 = vld [vmem:[#allocation8 + $0x44] ss:$8 sps:$4 sm:$0xff]  }
  0x40   :  { %718 = vmatprep.mubr.bf16.mxu1 %v1187_v24  ;;  %v1211_v25 = vld [vmem:[#allocation8 + $0x4] ss:$8 sps:$4 sm:$0xff]  }
  0x41   :  { %1094 = vmatpush3.bf16.msra.mxu0 %v1163_v2  ;;  %v1197_v24 = vld [vmem:[#allocation8 + $0x84] ss:$8 sps:$4 sm:$0xff]  }
  0x42   :  { %1095 = vmatprep.subr.bf16.mxu0 %v1164_v3 }
  0x45   :  { %1096 = vmatpush3.bf16.msra.mxu0 %v1164_v3 }
  0x46   :  { %1097 = vmatprep.subr.bf16.mxu0 %v1165_v5 }
  0x49   :  { %1098 = vmatpush3.bf16.msra.mxu0 %v1165_v5 }
  0x4a   :  { %1099 = vmatprep.subr.bf16.mxu0 %v1166_v6 }
  0x4d   :  { %1100 = vmatpush3.bf16.msra.mxu0 %v1166_v6 }
  0x4e   :  { %1101 = vmatprep.subr.bf16.mxu0 %v1167_v7 }
  0x51   :  { %1102 = vmatpush3.bf16.msra.mxu0 %v1167_v7 }
  0x52   :  { %1103 = vmatprep.subr.bf16.mxu0 %v1168_v8 }
  0x55   :  { %1104 = vmatpush3.bf16.msra.mxu0 %v1168_v8 }
  0x58   :  { %1106 = vmatmul.mubr.bf16.vlgmr.msra.gmra.mrb[0].mxu0 %v1170_v9 }
  0x59   :  { %1109 = vmatprep.mubr.bf16.mxu0 %v1171_v10  ;;  %v1185_v10 = vld [vmem:[#allocation8 + $0x40] ss:$8 sps:$4 sm:$0xff]  }
  0x60   :  { %1110 = vmatmul.mubr.bf16.gmra.mrb[4].mxu0 %v1172_v11  ;;  %v1209_v11 = vld [vmem:[#allocation8] ss:$8 sps:$4 sm:$0xff]  }
  0x61   :  { %1113 = vmatprep.mubr.bf16.mxu0 %v1173_v12  ;;  %v1188_v12 = vld [vmem:[#allocation8 + $0x54] ss:$8 sps:$4 sm:$0xff]  }
  0x68   :  { %1114 = vmatmul.mubr.bf16.gmra.mrb[8].mxu0 %v1174_v13  ;;  %v1215_v13 = vld [vmem:[#allocation8 + $0x14] ss:$8 sps:$4 sm:$0xff]  }
  0x69   :  { %1117 = vmatprep.mubr.bf16.mxu0 %v1175_v14  ;;  %v1190_v14 = vld [vmem:[#allocation8 + $0x50] ss:$8 sps:$4 sm:$0xff]  }
  0x70   :  { %1118 = vmatmul.mubr.bf16.gmra.mrb[12].mxu0 %v1176_v15  ;;  %v1217_v15 = vld [vmem:[#allocation8 + $0x10] ss:$8 sps:$4 sm:$0xff]  }
  0x71   :  { %1121 = vmatprep.mubr.bf16.mxu0 %v1177_v16  ;;  %v1191_v16 = vld [vmem:[#allocation8 + $0x64] ss:$8 sps:$4 sm:$0xff]  }
  0x78   :  { %1122 = vmatmul.mubr.bf16.gmra.mrb[16].mxu0 %v1178_v17  ;;  %v1221_v17 = vld [vmem:[#allocation8 + $0x24] ss:$8 sps:$4 sm:$0xff]  }
  0x79   :  { %1125 = vmatprep.mubr.bf16.mxu0 %v1179_v18  ;;  %v1193_v18 = vld [vmem:[#allocation8 + $0x60] ss:$8 sps:$4 sm:$0xff]  }
  0x80   :  { %1126 = vmatmul.mubr.bf16.gmra.mrb[20].mxu0 %v1180_v19  ;;  %v1223_v19 = vld [vmem:[#allocation8 + $0x20] ss:$8 sps:$4 sm:$0xff]  }
  0x81   :  { %1129 = vmatprep.mubr.bf16.mxu0 %v1181_v20  ;;  %v1194_v20 = vld [vmem:[#allocation8 + $0x74] ss:$8 sps:$4 sm:$0xff]  }
  0x88   :  { %1130 = vmatmul.mubr.bf16.gmra.mrb[24].mxu0 %v1182_v21  ;;  %v1227_v21 = vld [vmem:[#allocation8 + $0x34] ss:$8 sps:$4 sm:$0xff]  }
  0x89   :  { %1133 = vmatprep.mubr.bf16.mxu0 %v1183_v22  ;;  %v1196_v22 = vld [vmem:[#allocation8 + $0x70] ss:$8 sps:$4 sm:$0xff]  }
  0x90   :  { %1134 = vmatmul.mubr.bf16.gmra.mrb[28].mxu0 %v1184_v23  ;;  %v1229_v23 = vld [vmem:[#allocation8 + $0x30] ss:$8 sps:$4 sm:$0xff]  }
  0x91   :  { %686 = vmatprep.mubr.bf16.mxu0 %v1211_v25  ;;  %v1199_v25 = vld [vmem:[#allocation8 + $0x80] ss:$8 sps:$4 sm:$0xff]  }
 0x12b   :  { %v1107_v26 = vpop.f32.mrb[0].mxu0 }
 0x12c   :  { %v287_v27 = vpop.f32.mrb[1].mxu0 }
 0x12d   :  { %v1108_v28 = vpop.f32.mrb[2].mxu0 }
 0x12e   :  { %v415_v29 = vpack.c.bf16 %v1108_v28, %v1107_v26  ;;  %v290_v30 = vpop.f32.mrb[3].mxu0  ;;  %v1200_v26 = vld [vmem:[#allocation8 + $0x94] ss:$8 sps:$4 sm:$0xff]   ;;  %v1203_v28 = vld [vmem:[#allocation8 + $0xa4] ss:$8 sps:$4 sm:$0xff]  }
 0x12f   :  { %v414_v31 = vpack.c.bf16 %v290_v30, %v287_v27  ;;  %v1202_v27 = vld [vmem:[#allocation8 + $0x90] ss:$8 sps:$4 sm:$0xff]   ;;  %v1206_v30 = vld [vmem:[#allocation8 + $0xb4] ss:$8 sps:$4 sm:$0xff]  }
 0x133   :  { %v1111_v32 = vpop.f32.mrb[4].mxu0 }
 0x134   :  { %v303_v33 = vpop.f32.mrb[5].mxu0 }
 0x135   :  { %v1112_v34 = vpop.f32.mrb[6].mxu0 }
 0x136   :  { %v417_v35 = vpack.c.bf16 %v1112_v34, %v1111_v32  ;;  %v306_v36 = vpop.f32.mrb[7].mxu0  ;;  %v1212_v32 = vld [vmem:[#allocation8 + $0xc4] ss:$8 sps:$4 sm:$0xff]   ;;  %v1218_v34 = vld [vmem:[#allocation8 + $0xd4] ss:$8 sps:$4 sm:$0xff]  }
 0x137   :  { %v416_v37 = vpack.c.bf16 %v306_v36, %v303_v33  ;;  %v1214_v33 = vld [vmem:[#allocation8 + $0xc0] ss:$8 sps:$4 sm:$0xff]   ;;  %v1224_v36 = vld [vmem:[#allocation8 + $0xe4] ss:$8 sps:$4 sm:$0xff]  }
 0x13b   :  { %v1115_v38 = vpop.f32.mrb[8].mxu0 }
 0x13c   :  { %v319_v39 = vpop.f32.mrb[9].mxu0 }
 0x13d   :  { %v1116_v40 = vpop.f32.mrb[10].mxu0 }
 0x13e   :  { %v419_v41 = vpack.c.bf16 %v1116_v40, %v1115_v38  ;;  %v322_v42 = vpop.f32.mrb[11].mxu0  ;;  %v1230_v38 = vld [vmem:[#allocation8 + $0xf4] ss:$8 sps:$4 sm:$0xff]  }
 0x13f   :  { %v418_v43 = vpack.c.bf16 %v322_v42, %v319_v39  ;;  %v1232_v39 = vld [vmem:[#allocation8 + $0xf0] ss:$8 sps:$4 sm:$0xff]  }
 0x143   :  { %v1119_v44 = vpop.f32.mrb[12].mxu0 }
 0x144   :  { %v335_v45 = vpop.f32.mrb[13].mxu0 }
 0x145   :  { %v1120_v46 = vpop.f32.mrb[14].mxu0 }
 0x146   :  { %v421_v47 = vpack.c.bf16 %v1120_v46, %v1119_v44  ;;  %v338_v48 = vpop.f32.mrb[15].mxu0 }
 0x147   :  { %v420_v49 = vpack.c.bf16 %v338_v48, %v335_v45 }
 0x14b   :  { %v1123_v50 = vpop.f32.mrb[16].mxu0 }
 0x14c   :  { %v351_v51 = vpop.f32.mrb[17].mxu0 }
 0x14d   :  { %v1124_v52 = vpop.f32.mrb[18].mxu0 }
 0x14e   :  { %v423_v53 = vpack.c.bf16 %v1124_v52, %v1123_v50  ;;  %v354_v54 = vpop.f32.mrb[19].mxu0 }
 0x14f   :  { %v422_v55 = vpack.c.bf16 %v354_v54, %v351_v51 }
 0x151   :  { %977 = vmatprep.subr.bf16.mxu0 %v422_v55  ;;  %1137 = vmatprep.subr.bf16.mxu1 %v422_v55 }
 0x152   :  { %978 = vmatpush3.bf16.msra.mxu0 %v414_v31  ;;  %1145 = vmatpush3.bf16.msra.mxu1 %v414_v31  ;;  %v1208_v31 = vld [vmem:[#allocation8 + $0xb0] ss:$8 sps:$4 sm:$0xff]  }
 0x153   :  { %v1127_v56 = vpop.f32.mrb[20].mxu0  ;;  %979 = vmatprep.subr.bf16.mxu0 %v423_v53  ;;  %1138 = vmatprep.subr.bf16.mxu1 %v423_v53 }
 0x154   :  { %v367_v57 = vpop.f32.mrb[21].mxu0 }
 0x155   :  { %v1128_v58 = vpop.f32.mrb[22].mxu0 }
 0x156   :  { %v425_v59 = vpack.c.bf16 %v1128_v58, %v1127_v56  ;;  %v370_v60 = vpop.f32.mrb[23].mxu0  ;;  %980 = vmatpush3.bf16.msra.mxu0 %v415_v29  ;;  %1146 = vmatpush3.bf16.msra.mxu1 %v415_v29  ;;  %v1205_v29 = vld [vmem:[#allocation8 + $0xa0] ss:$8 sps:$4 sm:$0xff]  }
 0x157   :  { %v424_v61 = vpack.c.bf16 %v370_v60, %v367_v57 }
 0x159   :  { %981 = vmatprep.subr.bf16.mxu0 %v424_v61  ;;  %1139 = vmatprep.subr.bf16.mxu1 %v424_v61 }
 0x15a   :  { %982 = vmatpush3.bf16.msra.mxu0 %v416_v37  ;;  %1147 = vmatpush3.bf16.msra.mxu1 %v416_v37  ;;  %v1226_v37 = vld [vmem:[#allocation8 + $0xe0] ss:$8 sps:$4 sm:$0xff]  }
 0x15b   :  { %v1131_v62 = vpop.f32.mrb[24].mxu0  ;;  %983 = vmatprep.subr.bf16.mxu0 %v425_v59  ;;  %1140 = vmatprep.subr.bf16.mxu1 %v425_v59 }
 0x15c   :  { %v383_v63 = vpop.f32.mrb[25].mxu0 }
 0x15d   :  { %v1132_v0 = vpop.f32.mrb[26].mxu0 }
 0x15e   :  { %v427_v1 = vpack.c.bf16 %v1132_v0, %v1131_v62  ;;  %v386_v2 = vpop.f32.mrb[27].mxu0  ;;  %984 = vmatpush3.bf16.msra.mxu0 %v417_v35  ;;  %1148 = vmatpush3.bf16.msra.mxu1 %v417_v35  ;;  %v1220_v35 = vld [vmem:[#allocation8 + $0xd0] ss:$8 sps:$4 sm:$0xff]  }
 0x15f   :  { %v426_v3 = vpack.c.bf16 %v386_v2, %v383_v63 }
 0x161   :  { %985 = vmatprep.subr.bf16.mxu0 %v426_v3  ;;  %1141 = vmatprep.subr.bf16.mxu1 %v426_v3 }
 0x162   :  { %986 = vmatpush3.bf16.msra.mxu0 %v418_v43  ;;  %1149 = vmatpush3.bf16.msra.mxu1 %v418_v43 }
 0x163   :  { %v1135_v4 = vpop.f32.mrb[28].mxu0  ;;  %987 = vmatprep.subr.bf16.mxu0 %v427_v1  ;;  %1142 = vmatprep.subr.bf16.mxu1 %v427_v1 }
 0x164   :  { %v399_v5 = vpop.f32.mrb[29].mxu0 }
 0x165   :  { %v1136_v6 = vpop.f32.mrb[30].mxu0 }
 0x166   :  { %v429_v7 = vpack.c.bf16 %v1136_v6, %v1135_v4  ;;  %v402_v8 = vpop.f32.mrb[31].mxu0  ;;  %988 = vmatpush3.bf16.msra.mxu0 %v419_v41  ;;  %1150 = vmatpush3.bf16.msra.mxu1 %v419_v41 }
 0x167   :  { %v428_v9 = vpack.c.bf16 %v402_v8, %v399_v5 }
 0x169   :  { %989 = vmatprep.subr.bf16.mxu0 %v428_v9  ;;  %1143 = vmatprep.subr.bf16.mxu1 %v428_v9 }
 0x16a   :  { %990 = vmatpush3.bf16.msra.mxu0 %v420_v49  ;;  %1151 = vmatpush3.bf16.msra.mxu1 %v420_v49 }
 0x16b   :  { %991 = vmatprep.subr.bf16.mxu0 %v429_v7  ;;  %1144 = vmatprep.subr.bf16.mxu1 %v429_v7 }
 0x16e   :  { %992 = vmatpush3.bf16.msra.mxu0 %v421_v47  ;;  %1152 = vmatpush3.bf16.msra.mxu1 %v421_v47 }
 0x171   :  { %719 = vmatmul.mubr.bf16.vlgmr.msra.gmra.mrb[0].mxu1 %v1185_v10  ;;  %687 = vmatmul.mubr.bf16.vlgmr.msra.gmra.mrb[32].mxu0 %v1209_v11 }
 0x172   :  { %726 = vmatprep.mubr.bf16.mxu1 %v1188_v12  ;;  %694 = vmatprep.mubr.bf16.mxu0 %v1215_v13 }
 0x179   :  { %727 = vmatmul.mubr.bf16.gmra.mrb[4].mxu1 %v1190_v14  ;;  %695 = vmatmul.mubr.bf16.gmra.mrb[36].mxu0 %v1217_v15 }
 0x17a   :  { %734 = vmatprep.mubr.bf16.mxu1 %v1191_v16  ;;  %702 = vmatprep.mubr.bf16.mxu0 %v1221_v17 }
 0x181   :  { %735 = vmatmul.mubr.bf16.gmra.mrb[8].mxu1 %v1193_v18  ;;  %703 = vmatmul.mubr.bf16.gmra.mrb[40].mxu0 %v1223_v19 }
 0x182   :  { %742 = vmatprep.mubr.bf16.mxu1 %v1194_v20  ;;  %710 = vmatprep.mubr.bf16.mxu0 %v1227_v21 }
 0x189   :  { %743 = vmatmul.mubr.bf16.gmra.mrb[12].mxu1 %v1196_v22  ;;  %711 = vmatmul.mubr.bf16.gmra.mrb[44].mxu0 %v1229_v23 }
 0x18a   :  { %750 = vmatprep.mubr.bf16.mxu1 %v1197_v24 }
 0x191   :  { %751 = vmatmul.mubr.bf16.gmra.mrb[16].mxu1 %v1199_v25 }
 0x192   :  { %758 = vmatprep.mubr.bf16.mxu1 %v1200_v26 }
 0x199   :  { %759 = vmatmul.mubr.bf16.gmra.mrb[20].mxu1 %v1202_v27 }
 0x19a   :  { %766 = vmatprep.mubr.bf16.mxu1 %v1203_v28 }
 0x1a1   :  { %767 = vmatmul.mubr.bf16.gmra.mrb[24].mxu1 %v1205_v29 }
 0x1a2   :  { %774 = vmatprep.mubr.bf16.mxu1 %v1206_v30 }
 0x1a9   :  { %775 = vmatmul.mubr.bf16.gmra.mrb[28].mxu1 %v1208_v31 }
 0x1aa   :  { %782 = vmatprep.mubr.bf16.mxu1 %v1212_v32 }
 0x1b1   :  { %783 = vmatmul.mubr.bf16.gmra.mrb[32].mxu1 %v1214_v33 }
 0x1b2   :  { %790 = vmatprep.mubr.bf16.mxu1 %v1218_v34 }
 0x1b9   :  { %791 = vmatmul.mubr.bf16.gmra.mrb[36].mxu1 %v1220_v35 }
 0x1ba   :  { %798 = vmatprep.mubr.bf16.mxu1 %v1224_v36 }
 0x1c1   :  { %799 = vmatmul.mubr.bf16.gmra.mrb[40].mxu1 %v1226_v37 }
 0x1c2   :  { %806 = vmatprep.mubr.bf16.mxu1 %v1230_v38 }
 0x1c9   :  { %807 = vmatmul.mubr.bf16.gmra.mrb[44].mxu1 %v1232_v39 }
 0x244   :  { %v1017_v40 = vpop.f32.mrb[0].mxu1  ;;  %v993_v41 = vpop.f32.mrb[32].mxu0 }
 0x245   :  { %v1018_v42 = vpop.f32.mrb[1].mxu1  ;;  %v994_v43 = vpop.f32.mrb[33].mxu0 }
 0x246   :  { %v1019_v44 = vadd.f32 %v1018_v42, %v1017_v40  ;;  %v1020_v45 = vpop.f32.mrb[2].mxu1  ;;  %v995_v46 = vadd.f32 %v994_v43, %v993_v41  ;;  %v996_v47 = vpop.f32.mrb[34].mxu0 }
 0x247   :  { %v1021_v48 = vpop.f32.mrb[3].mxu1  ;;  %v997_v49 = vpop.f32.mrb[35].mxu0 }
 0x248   :  { %v823_v50 = vmax.f32 %v1019_v44, 0.0  ;;  %v1022_v51 = vadd.f32 %v1021_v48, %v1020_v45  ;;  %v815_v52 = vmax.f32 %v995_v46, 0.0  ;;  %v998_v53 = vadd.f32 %v997_v49, %v996_v47 }
 0x24a   :  { %855 = vst [vmem:[#allocation9 + $0x40] sm:$0xff] %v823_v50  ;;  %v824_v54 = vmax.f32 %v1022_v51, 0.0  ;;  %847 = vst [vmem:[#allocation9] sm:$0xff] %v815_v52  ;;  %v816_v55 = vmax.f32 %v998_v53, 0.0 }
 0x24c   :  { %856 = vst [vmem:[#allocation9 + $0x48] sm:$0xff] %v824_v54  ;;  %v1023_v56 = vpop.f32.mrb[4].mxu1  ;;  %848 = vst [vmem:[#allocation9 + $0x8] sm:$0xff] %v816_v55  ;;  %v999_v57 = vpop.f32.mrb[36].mxu0 }
 0x24d   :  { %v1024_v58 = vpop.f32.mrb[5].mxu1  ;;  %v1000_v59 = vpop.f32.mrb[37].mxu0 }
 0x24e   :  { %v1025_v60 = vadd.f32 %v1024_v58, %v1023_v56  ;;  %v1026_v61 = vpop.f32.mrb[6].mxu1  ;;  %v1001_v62 = vadd.f32 %v1000_v59, %v999_v57  ;;  %v1002_v63 = vpop.f32.mrb[38].mxu0 }
 0x24f   :  { %v1027_v0 = vpop.f32.mrb[7].mxu1  ;;  %v1003_v1 = vpop.f32.mrb[39].mxu0 }
 0x250   :  { %v825_v2 = vmax.f32 %v1025_v60, 0.0  ;;  %v1028_v3 = vadd.f32 %v1027_v0, %v1026_v61  ;;  %v817_v4 = vmax.f32 %v1001_v62, 0.0  ;;  %v1004_v5 = vadd.f32 %v1003_v1, %v1002_v63 }
 0x252   :  { %857 = vst [vmem:[#allocation9 + $0x50] sm:$0xff] %v825_v2  ;;  %v826_v6 = vmax.f32 %v1028_v3, 0.0  ;;  %849 = vst [vmem:[#allocation9 + $0x10] sm:$0xff] %v817_v4  ;;  %v818_v7 = vmax.f32 %v1004_v5, 0.0 }
 0x254   :  { %858 = vst [vmem:[#allocation9 + $0x58] sm:$0xff] %v826_v6  ;;  %v1029_v8 = vpop.f32.mrb[8].mxu1  ;;  %850 = vst [vmem:[#allocation9 + $0x18] sm:$0xff] %v818_v7  ;;  %v1005_v9 = vpop.f32.mrb[40].mxu0 }
 0x255   :  { %v1030_v10 = vpop.f32.mrb[9].mxu1  ;;  %v1006_v11 = vpop.f32.mrb[41].mxu0 }
 0x256   :  { %v1031_v12 = vadd.f32 %v1030_v10, %v1029_v8  ;;  %v1032_v13 = vpop.f32.mrb[10].mxu1  ;;  %v1007_v14 = vadd.f32 %v1006_v11, %v1005_v9  ;;  %v1008_v15 = vpop.f32.mrb[42].mxu0 }
 0x257   :  { %v1033_v16 = vpop.f32.mrb[11].mxu1  ;;  %v1009_v17 = vpop.f32.mrb[43].mxu0 }
 0x258   :  { %v827_v18 = vmax.f32 %v1031_v12, 0.0  ;;  %v1034_v19 = vadd.f32 %v1033_v16, %v1032_v13  ;;  %v819_v20 = vmax.f32 %v1007_v14, 0.0  ;;  %v1010_v21 = vadd.f32 %v1009_v17, %v1008_v15 }
 0x25a   :  { %859 = vst [vmem:[#allocation9 + $0x60] sm:$0xff] %v827_v18  ;;  %v828_v22 = vmax.f32 %v1034_v19, 0.0  ;;  %851 = vst [vmem:[#allocation9 + $0x20] sm:$0xff] %v819_v20  ;;  %v820_v23 = vmax.f32 %v1010_v21, 0.0 }
 0x25c   :  { %860 = vst [vmem:[#allocation9 + $0x68] sm:$0xff] %v828_v22  ;;  %v1035_v24 = vpop.f32.mrb[12].mxu1  ;;  %852 = vst [vmem:[#allocation9 + $0x28] sm:$0xff] %v820_v23  ;;  %v1011_v25 = vpop.f32.mrb[44].mxu0 }
 0x25d   :  { %v1036_v26 = vpop.f32.mrb[13].mxu1  ;;  %v1012_v27 = vpop.f32.mrb[45].mxu0 }
 0x25e   :  { %v1037_v28 = vadd.f32 %v1036_v26, %v1035_v24  ;;  %v1038_v29 = vpop.f32.mrb[14].mxu1  ;;  %v1013_v30 = vadd.f32 %v1012_v27, %v1011_v25  ;;  %v1014_v31 = vpop.f32.mrb[46].mxu0 }
 0x25f   :  { %v1039_v32 = vpop.f32.mrb[15].mxu1  ;;  %v1015_v33 = vpop.f32.mrb[47].mxu0 }
 0x260   :  { %v829_v34 = vmax.f32 %v1037_v28, 0.0  ;;  %v1040_v35 = vadd.f32 %v1039_v32, %v1038_v29  ;;  %v821_v36 = vmax.f32 %v1013_v30, 0.0  ;;  %v1016_v37 = vadd.f32 %v1015_v33, %v1014_v31 }
 0x262   :  { %861 = vst [vmem:[#allocation9 + $0x70] sm:$0xff] %v829_v34  ;;  %v830_v38 = vmax.f32 %v1040_v35, 0.0  ;;  %853 = vst [vmem:[#allocation9 + $0x30] sm:$0xff] %v821_v36  ;;  %v822_v39 = vmax.f32 %v1016_v37, 0.0 }
 0x264   :  { %862 = vst [vmem:[#allocation9 + $0x78] sm:$0xff] %v830_v38  ;;  %v1041_v40 = vpop.f32.mrb[16].mxu1  ;;  %854 = vst [vmem:[#allocation9 + $0x38] sm:$0xff] %v822_v39 }
 0x265   :  { %v1042_v41 = vpop.f32.mrb[17].mxu1 }
 0x266   :  { %v1043_v42 = vadd.f32 %v1042_v41, %v1041_v40  ;;  %v1044_v43 = vpop.f32.mrb[18].mxu1 }
 0x267   :  { %v1045_v44 = vpop.f32.mrb[19].mxu1 }
 0x268   :  { %v831_v45 = vmax.f32 %v1043_v42, 0.0  ;;  %v1046_v46 = vadd.f32 %v1045_v44, %v1044_v43 }
 0x26a   :  { %863 = vst [vmem:[#allocation9 + $0x80] sm:$0xff] %v831_v45  ;;  %v832_v47 = vmax.f32 %v1046_v46, 0.0 }
 0x26c   :  { %864 = vst [vmem:[#allocation9 + $0x88] sm:$0xff] %v832_v47  ;;  %v1047_v48 = vpop.f32.mrb[20].mxu1 }
 0x26d   :  { %v1048_v49 = vpop.f32.mrb[21].mxu1 }
 0x26e   :  { %v1049_v50 = vadd.f32 %v1048_v49, %v1047_v48  ;;  %v1050_v51 = vpop.f32.mrb[22].mxu1 }
 0x26f   :  { %v1051_v52 = vpop.f32.mrb[23].mxu1 }
 0x270   :  { %v833_v53 = vmax.f32 %v1049_v50, 0.0  ;;  %v1052_v54 = vadd.f32 %v1051_v52, %v1050_v51 }
 0x272   :  { %865 = vst [vmem:[#allocation9 + $0x90] sm:$0xff] %v833_v53  ;;  %v834_v55 = vmax.f32 %v1052_v54, 0.0 }
 0x274   :  { %866 = vst [vmem:[#allocation9 + $0x98] sm:$0xff] %v834_v55  ;;  %v1053_v56 = vpop.f32.mrb[24].mxu1 }
 0x275   :  { %v1054_v57 = vpop.f32.mrb[25].mxu1 }
 0x276   :  { %v1055_v58 = vadd.f32 %v1054_v57, %v1053_v56  ;;  %v1056_v59 = vpop.f32.mrb[26].mxu1 }
 0x277   :  { %v1057_v60 = vpop.f32.mrb[27].mxu1 }
 0x278   :  { %v835_v61 = vmax.f32 %v1055_v58, 0.0  ;;  %v1058_v62 = vadd.f32 %v1057_v60, %v1056_v59 }
 0x27a   :  { %867 = vst [vmem:[#allocation9 + $0xa0] sm:$0xff] %v835_v61  ;;  %v836_v63 = vmax.f32 %v1058_v62, 0.0 }
 0x27c   :  { %868 = vst [vmem:[#allocation9 + $0xa8] sm:$0xff] %v836_v63  ;;  %v1059_v0 = vpop.f32.mrb[28].mxu1 }
 0x27d   :  { %v1060_v1 = vpop.f32.mrb[29].mxu1 }
 0x27e   :  { %v1061_v2 = vadd.f32 %v1060_v1, %v1059_v0  ;;  %v1062_v3 = vpop.f32.mrb[30].mxu1 }
 0x27f   :  { %v1063_v4 = vpop.f32.mrb[31].mxu1 }
 0x280   :  { %v837_v5 = vmax.f32 %v1061_v2, 0.0  ;;  %v1064_v6 = vadd.f32 %v1063_v4, %v1062_v3 }
 0x282   :  { %869 = vst [vmem:[#allocation9 + $0xb0] sm:$0xff] %v837_v5  ;;  %v838_v7 = vmax.f32 %v1064_v6, 0.0 }
 0x284   :  { %870 = vst [vmem:[#allocation9 + $0xb8] sm:$0xff] %v838_v7  ;;  %v1065_v8 = vpop.f32.mrb[32].mxu1 }
 0x285   :  { %v1066_v9 = vpop.f32.mrb[33].mxu1 }
 0x286   :  { %v1067_v10 = vadd.f32 %v1066_v9, %v1065_v8  ;;  %v1068_v11 = vpop.f32.mrb[34].mxu1 }
 0x287   :  { %v1069_v12 = vpop.f32.mrb[35].mxu1 }
 0x288   :  { %v839_v13 = vmax.f32 %v1067_v10, 0.0  ;;  %v1070_v14 = vadd.f32 %v1069_v12, %v1068_v11 }
 0x28a   :  { %871 = vst [vmem:[#allocation9 + $0xc0] sm:$0xff] %v839_v13  ;;  %v840_v15 = vmax.f32 %v1070_v14, 0.0 }
 0x28c   :  { %872 = vst [vmem:[#allocation9 + $0xc8] sm:$0xff] %v840_v15  ;;  %v1071_v16 = vpop.f32.mrb[36].mxu1 }
 0x28d   :  { %v1072_v17 = vpop.f32.mrb[37].mxu1 }
 0x28e   :  { %v1073_v18 = vadd.f32 %v1072_v17, %v1071_v16  ;;  %v1074_v19 = vpop.f32.mrb[38].mxu1 }
 0x28f   :  { %v1075_v20 = vpop.f32.mrb[39].mxu1 }
 0x290   :  { %v841_v21 = vmax.f32 %v1073_v18, 0.0  ;;  %v1076_v22 = vadd.f32 %v1075_v20, %v1074_v19 }
 0x292   :  { %873 = vst [vmem:[#allocation9 + $0xd0] sm:$0xff] %v841_v21  ;;  %v842_v23 = vmax.f32 %v1076_v22, 0.0 }
 0x294   :  { %874 = vst [vmem:[#allocation9 + $0xd8] sm:$0xff] %v842_v23  ;;  %v1077_v24 = vpop.f32.mrb[40].mxu1 }
 0x295   :  { %v1078_v25 = vpop.f32.mrb[41].mxu1 }
 0x296   :  { %v1079_v26 = vadd.f32 %v1078_v25, %v1077_v24  ;;  %v1080_v27 = vpop.f32.mrb[42].mxu1 }
 0x297   :  { %v1081_v28 = vpop.f32.mrb[43].mxu1 }
 0x298   :  { %v843_v29 = vmax.f32 %v1079_v26, 0.0  ;;  %v1082_v30 = vadd.f32 %v1081_v28, %v1080_v27 }
 0x29a   :  { %875 = vst [vmem:[#allocation9 + $0xe0] sm:$0xff] %v843_v29  ;;  %v844_v31 = vmax.f32 %v1082_v30, 0.0 }
 0x29c   :  { %876 = vst [vmem:[#allocation9 + $0xe8] sm:$0xff] %v844_v31  ;;  %v1083_v32 = vpop.f32.mrb[44].mxu1 }
 0x29d   :  { %v1084_v33 = vpop.f32.mrb[45].mxu1 }
 0x29e   :  { %v1085_v34 = vadd.f32 %v1084_v33, %v1083_v32  ;;  %v1086_v35 = vpop.f32.mrb[46].mxu1 }
 0x29f   :  { %v1087_v36 = vpop.f32.mrb[47].mxu1 }
 0x2a0   :  { %v845_v37 = vmax.f32 %v1085_v34, 0.0  ;;  %v1088_v38 = vadd.f32 %v1087_v36, %v1086_v35 }
 0x2a2   :  { %877 = vst [vmem:[#allocation9 + $0xf0] sm:$0xff] %v845_v37  ;;  %v846_v39 = vmax.f32 %v1088_v38, 0.0 }
 0x2a4   :  { %878 = vst [vmem:[#allocation9 + $0xf8] sm:$0xff] %v846_v39 }
 0x2a5   :  { %1310 = shalt.err (!%p1307_p0)
}
 0x2a6   :  { %s1311_s27 = scalar_lea.hbm %s1419_s3, 4096 }
 0x2a7   :  { %p1312_p1 = scmp.ne.s32.totalorder %s1419_s3, %s1311_s27  ;;  %p1315_p2 = scmp.lt.u32.totalorder %s1311_s27, %s1419_s3 }
 0x2a9   :  { %p1317_p3 = pnand %p1315_p2, %p1312_p1 }
 0x2ab   :  { %1320 = shalt.err (!%p1317_p3)
}
 0x2ac   :  { %890 = dma.vmem_to_hbm [thread:$0]  %s885_s23, 4096, %s1419_s3, [#allocation5], %s1332_s0, %s1332_s0, %s1333_s15  }
 0x2ad   :  { %1325 = dma.done.wait [#allocation5], 4096  }
 0x2ae   :  { %1326 = vsyncadd [#allocation5], 4294963200 }
 0x2af   :  { %894 = vsyncpa [#allocation4], 1 }
 0x2b0   :  { %895 = vsyncpa [#allocation7], 1 }
 0x2b1   :  { %896 = vsyncpa [#allocation5], 1 }

</bundles_post_ra>
